<compile_context>
chip_gen: v7x
topology: tpu7x:2x2x1
jax: 0.10.0
libtpu: 0.0.40
codegen_flags: <defaults>
</compile_context>

<pallas_src>
import math

import jax
import jax.numpy as jnp
from jax.experimental import pallas as pl
from jax.experimental.pallas import tpu as pltpu


def _make_convnet_kernel(L_pad, L_out, K):
    """Build the kernel closure over the static layout parameters."""

    def kernel(xs_ref, w1_ref, b1_ref, w2t_ref, b2_ref, o_ref):
        # xs_ref : (K, NLp)   im2col rows: xs[k, n*L_pad + t] = x[n, t+k] (t<L_out), 0 in pad lanes
        # w1_ref : (C, K)     Conv1d weight (in_ch=1 squeezed)
        # b1_ref : (C, 1)     Conv1d bias
        # w2t_ref: (K_pad, C) ConvTranspose1d weight, transposed + padded to >=8 sublanes
        # b2_ref : (1,)       SMEM scalar ConvTranspose1d bias
        # o_ref  : (1, NLp)   lane-dense output slab
        xs = xs_ref[...]                       # (K, NLp)
        w1 = w1_ref[...]                       # (C, K)
        b1 = b1_ref[...]                       # (C, 1)
        w2t = w2t_ref[...]                     # (K_pad, C)
        NLp = xs.shape[1]

        # ---- Conv1d(1, C, K): K unrolled VPU MACs on the lane-dense slab ----
        # acc[c, n*L_pad + t] = sum_k w1[c, k] * x[n, t + k]
        acc = w1[:, 0:1] * xs[0:1, :]                          # (C, NLp)
        for k in range(1, K):                                   # K static, unrolled
            acc = acc + w1[:, k:k + 1] * xs[k:k + 1, :]
        # Bias folded into the ReLU: single (C,1) broadcast, no full-slab splat.
        h = jnp.maximum(acc + b1, 0.0)                          # (C, NLp)

        # ---- ConvTranspose1d channel contraction: one MXU matmul ------------
        # p[k, n*L_pad + t] = sum_c w2[c, k] * h[n, c, t]
        p = jnp.dot(w2t, h, preferred_element_type=jnp.float32)  # (K_pad, NLp)

        # Zero the per-batch pad lanes so the overlap-add rolls below cannot
        # bleed across batch blocks (pad positions hold relu(b1) garbage).
        lane = jax.lax.broadcasted_iota(jnp.int32, (1, NLp), 1)
        p = jnp.where((lane % L_pad) < L_out, p, 0.0)

        # ---- Overlap-add: K static lane rolls (XLU slot) + adds -------------
        # out[n*L_pad + s] = b2 + sum_k p[k, n*L_pad + (s - k)]
        out = jnp.full((1, NLp), b2_ref[0], jnp.float32) + p[0:1, :]
        for k in range(1, K):
            out = out + pltpu.roll(p[k:k + 1, :], shift=k, axis=1)
        o_ref[...] = out.astype(o_ref.dtype)

    return kernel


def _choose_l_pad(N, L):
    # Smallest per-batch lane stride >= L that makes the slab lane-dense
    # (N * L_pad a multiple of 128).  Correctness only needs L_pad >= L, so
    # fall back to L for awkward N.
    for L_pad in range(L, L + 129):
        if (N * L_pad) % 128 == 0:
            return L_pad
    return L


def convnet_forward(x, w1, b1, w2, b2, length):
    """x: (N, length) float32. Returns (N, length) float32."""
    N, L = x.shape
    assert L == length
    C, _, K = w1.shape
    L_out = L - K + 1
    L_pad = _choose_l_pad(N, L)          # N=8, L=10 -> L_pad=16, NLp=128 (4 full vregs per C-slab row group)
    NLp = N * L_pad

    x32 = x.astype(jnp.float32)

    # Tiny (K, N*L_pad) im2col slab: row k holds x[:, k:k+L_out] per batch,
    # placed at lane offset n*L_pad, zeros in the pad lanes.
    cols = jnp.stack([x32[:, k:k + L_out] for k in range(K)], axis=0)   # (K, N, L_out)
    cols = jnp.pad(cols, ((0, 0), (0, 0), (0, L_pad - L_out)))          # (K, N, L_pad)
    xs = cols.reshape(K, NLp)

    w1_2d = w1[:, 0, :].astype(jnp.float32)                  # (C, K)
    b1_col = b1.reshape(C, 1).astype(jnp.float32)            # (C, 1)
    K_pad = max(K, 8)                                        # sublane-align the MXU LHS
    w2t = jnp.zeros((K_pad, C), jnp.float32).at[:K, :].set(
        jnp.transpose(w2[:, 0, :]).astype(jnp.float32))      # (K_pad, C), rows >= K are zero
    b2_1d = b2.reshape(1).astype(jnp.float32)                # (1,) -> SMEM scalar

    kernel = _make_convnet_kernel(L_pad, L_out, K)

    # Single grid step; every block is the full array (all tiny), one lane-dense
    # output DMA.
    out_flat = pl.pallas_call(
        kernel,
        out_shape=jax.ShapeDtypeStruct((1, NLp), jnp.float32),
        in_specs=[
            pl.BlockSpec(memory_space=pltpu.MemorySpace.VMEM),   # xs (im2col slab)
            pl.BlockSpec(memory_space=pltpu.MemorySpace.VMEM),   # w1
            pl.BlockSpec(memory_space=pltpu.MemorySpace.VMEM),   # b1
            pl.BlockSpec(memory_space=pltpu.MemorySpace.VMEM),   # w2^T (padded)
            pl.BlockSpec(memory_space=pltpu.MemorySpace.SMEM),   # b2 (scalar)
        ],
        out_specs=pl.BlockSpec(memory_space=pltpu.MemorySpace.VMEM),
    )(xs, w1_2d, b1_col, w2t, b2_1d)

    # Un-pad the lane-dense slab back to (N, L).
    return out_flat.reshape(N, L_pad)[:, :L]


def convnet_ref(x, w1, b1, w2, b2):
    """Pure-JAX reference of the PyTorch ConvNet forward."""
    N, L = x.shape
    C, _, K = w1.shape
    L_out = L - K + 1
    cols = jnp.stack([x[:, k:k + L_out] for k in range(K)], axis=-1)          # (N, L_out, K)
    h = jnp.einsum("ntk,ck->nct", cols, w1[:, 0, :]) + b1[None, :, None]      # Conv1d
    h = jnp.maximum(h, 0.0)                                                   # ReLU
    p = jnp.einsum("nct,ck->ntk", h, w2[:, 0, :])                             # tconv taps
    out = jnp.full((N, L), b2[0], dtype=jnp.float32)
    for k in range(K):
        out = out.at[:, k:k + L_out].add(p[:, :, k])
    return out.reshape(-1, L)


if __name__ == "__main__":
    # Module hyper-parameters (defaults of ConvNet)
    kernel_size = 3
    length = 10
    out_chan = 32
    N = 8

    key = jax.random.PRNGKey(0)
    k1, k2, k3, k4, kx = jax.random.split(key, 5)

    # Deterministic parameter init (PyTorch-style uniform bounds, synthetic values)
    bound1 = 1.0 / math.sqrt(1 * kernel_size)
    w1 = jax.random.uniform(k1, (out_chan, 1, kernel_size), jnp.float32, -bound1, bound1)
    b1 = jax.random.uniform(k2, (out_chan,), jnp.float32, -bound1, bound1)
    bound2 = 1.0 / math.sqrt(out_chan * kernel_size)
    w2 = jax.random.uniform(k3, (out_chan, 1, kernel_size), jnp.float32, -bound2, bound2)
    b2 = jax.random.uniform(k4, (1,), jnp.float32, -bound2, bound2)

    x = jax.random.normal(kx, (N, length), jnp.float32)

    y = convnet_forward(x, w1, b1, w2, b2, length)
    y = jax.block_until_ready(y)

    y_ref = convnet_ref(x, w1, b1, w2, b2)
    assert y.shape == (N, length)
    err = float(jnp.max(jnp.abs(y - y_ref)))
    assert bool(jnp.allclose(y, y_ref, atol=1e-4, rtol=1e-4)), f"mismatch: max abs err {err}"

    print("KERNEL_OK")
</pallas_src>

<mosaic_0001>
module attributes {stable_mosaic.version = 11 : i64} {
  func.func @kernel(%arg0: memref<3x128xf32, #tpu.memory_space<vmem>>, %arg1: memref<32x3xf32, #tpu.memory_space<vmem>>, %arg2: memref<32x1xf32, #tpu.memory_space<vmem>>, %arg3: memref<8x32xf32, #tpu.memory_space<vmem>>, %arg4: memref<1xf32, #tpu.memory_space<smem>>, %arg5: memref<1x128xf32, #tpu.memory_space<vmem>>) attributes {dimension_semantics = [], scalar_prefetch = 0 : i64, scratch_operands = 0 : i64, tpu.core_type = #tpu.core_type<tc>} {
    %c0 = arith.constant 0 : index
    %c0_0 = arith.constant 0 : index
    %0 = vector.load %arg0[%c0, %c0_0] : memref<3x128xf32, #tpu.memory_space<vmem>>, vector<3x128xf32>
    %c0_1 = arith.constant 0 : index
    %c0_2 = arith.constant 0 : index
    %1 = vector.load %arg1[%c0_1, %c0_2] : memref<32x3xf32, #tpu.memory_space<vmem>>, vector<32x3xf32>
    %c0_3 = arith.constant 0 : index
    %c0_4 = arith.constant 0 : index
    %2 = vector.load %arg2[%c0_3, %c0_4] : memref<32x1xf32, #tpu.memory_space<vmem>>, vector<32x1xf32>
    %c0_5 = arith.constant 0 : index
    %c0_6 = arith.constant 0 : index
    %3 = vector.load %arg3[%c0_5, %c0_6] : memref<8x32xf32, #tpu.memory_space<vmem>>, vector<8x32xf32>
    %4 = vector.extract_strided_slice %1 {offsets = [0, 0], sizes = [32, 1], strides = [1, 1]} : vector<32x3xf32> to vector<32x1xf32>
    %5 = vector.extract_strided_slice %0 {offsets = [0, 0], sizes = [1, 128], strides = [1, 1]} : vector<3x128xf32> to vector<1x128xf32>
    %6 = vector.broadcast %4 : vector<32x1xf32> to vector<32x128xf32>
    %7 = vector.broadcast %5 : vector<1x128xf32> to vector<32x128xf32>
    %8 = arith.mulf %6, %7 : vector<32x128xf32>
    %9 = vector.extract_strided_slice %1 {offsets = [0, 1], sizes = [32, 1], strides = [1, 1]} : vector<32x3xf32> to vector<32x1xf32>
    %10 = vector.extract_strided_slice %0 {offsets = [1, 0], sizes = [1, 128], strides = [1, 1]} : vector<3x128xf32> to vector<1x128xf32>
    %11 = vector.broadcast %9 : vector<32x1xf32> to vector<32x128xf32>
    %12 = vector.broadcast %10 : vector<1x128xf32> to vector<32x128xf32>
    %13 = arith.mulf %11, %12 : vector<32x128xf32>
    %14 = arith.addf %8, %13 : vector<32x128xf32>
    %15 = vector.extract_strided_slice %1 {offsets = [0, 2], sizes = [32, 1], strides = [1, 1]} : vector<32x3xf32> to vector<32x1xf32>
    %16 = vector.extract_strided_slice %0 {offsets = [2, 0], sizes = [1, 128], strides = [1, 1]} : vector<3x128xf32> to vector<1x128xf32>
    %17 = vector.broadcast %15 : vector<32x1xf32> to vector<32x128xf32>
    %18 = vector.broadcast %16 : vector<1x128xf32> to vector<32x128xf32>
    %19 = arith.mulf %17, %18 : vector<32x128xf32>
    %20 = arith.addf %14, %19 : vector<32x128xf32>
    %21 = vector.broadcast %2 : vector<32x1xf32> to vector<32x128xf32>
    %22 = arith.addf %20, %21 : vector<32x128xf32>
    %cst = arith.constant 0.000000e+00 : f32
    %23 = vector.broadcast %cst : f32 to vector<32x128xf32>
    %24 = arith.maximumf %22, %23 : vector<32x128xf32>
    %cst_7 = arith.constant dense<0.000000e+00> : vector<8x128xf32>
    %25 = tpu.matmul %3, %24, %cst_7 {dimension_numbers = #tpu.dot_dimension_numbers<[1], [0], [0], [1], [0, 0, 1, 1], [], []>} : vector<8x32xf32>, vector<32x128xf32>, vector<8x128xf32> -> vector<8x128xf32>
    %26 = tpu.iota {dimensions = array<i32: 1>} : vector<1x128xi32>
    %c16_i32 = arith.constant 16 : i32
    %c0_i32 = arith.constant 0 : i32
    %27 = arith.cmpi eq, %c16_i32, %c0_i32 : i32
    %c1_i32 = arith.constant 1 : i32
    %28 = arith.select %27, %c1_i32, %c16_i32 : i32
    %29 = vector.broadcast %28 : i32 to vector<1x128xi32>
    %30 = arith.remsi %26, %29 : vector<1x128xi32>
    %c0_i32_8 = arith.constant 0 : i32
    %31 = vector.broadcast %c0_i32_8 : i32 to vector<1x128xi32>
    %32 = arith.cmpi ne, %30, %31 : vector<1x128xi32>
    %c0_i32_9 = arith.constant 0 : i32
    %33 = vector.broadcast %c0_i32_9 : i32 to vector<1x128xi32>
    %34 = arith.cmpi slt, %30, %33 : vector<1x128xi32>
    %c0_i32_10 = arith.constant 0 : i32
    %35 = arith.cmpi slt, %28, %c0_i32_10 : i32
    %36 = vector.broadcast %35 : i1 to vector<1x128xi1>
    %37 = vector.broadcast %36 : vector<1x128xi1> to vector<1x128xi1>
    %38 = arith.xori %34, %37 : vector<1x128xi1>
    %39 = arith.andi %38, %32 : vector<1x128xi1>
    %40 = vector.broadcast %28 : i32 to vector<1x128xi32>
    %41 = arith.addi %30, %40 : vector<1x128xi32>
    %42 = arith.select %39, %41, %30 : vector<1x128xi1>, vector<1x128xi32>
    %c8_i32 = arith.constant 8 : i32
    %43 = vector.broadcast %c8_i32 : i32 to vector<1x128xi32>
    %44 = arith.cmpi slt, %42, %43 : vector<1x128xi32>
    %cst_11 = arith.constant 0.000000e+00 : f32
    %45 = vector.shape_cast %44 : vector<1x128xi1> to vector<1x128xi1>
    %46 = vector.broadcast %45 : vector<1x128xi1> to vector<8x128xi1>
    %47 = vector.broadcast %cst_11 : f32 to vector<8x128xf32>
    %48 = arith.select %46, %25, %47 : vector<8x128xi1>, vector<8x128xf32>
    %c0_12 = arith.constant 0 : index
    %49 = memref.load %arg4[%c0_12] : memref<1xf32, #tpu.memory_space<smem>>
    %50 = vector.broadcast %49 : f32 to vector<1x128xf32>
    %51 = vector.extract_strided_slice %48 {offsets = [0, 0], sizes = [1, 128], strides = [1, 1]} : vector<8x128xf32> to vector<1x128xf32>
    %52 = arith.addf %50, %51 : vector<1x128xf32>
    %53 = vector.extract_strided_slice %48 {offsets = [1, 0], sizes = [1, 128], strides = [1, 1]} : vector<8x128xf32> to vector<1x128xf32>
    %c1_i32_13 = arith.constant 1 : i32
    %54 = tpu.dynamic_rotate %53 by %c1_i32_13 dim 1 : vector<1x128xf32>, i32 -> vector<1x128xf32>
    %55 = arith.addf %52, %54 : vector<1x128xf32>
    %56 = vector.extract_strided_slice %48 {offsets = [2, 0], sizes = [1, 128], strides = [1, 1]} : vector<8x128xf32> to vector<1x128xf32>
    %c2_i32 = arith.constant 2 : i32
    %57 = tpu.dynamic_rotate %56 by %c2_i32 dim 1 : vector<1x128xf32>, i32 -> vector<1x128xf32>
    %58 = arith.addf %55, %57 : vector<1x128xf32>
    %c0_14 = arith.constant 0 : index
    %c0_15 = arith.constant 0 : index
    %59 = vector.load %arg5[%c0_14, %c0_15] : memref<1x128xf32, #tpu.memory_space<vmem>>, vector<1x128xf32>
    tpu.vector_store %arg5[%c0_14, %c0_15], %58 {strides = array<i32>} : memref<1x128xf32, #tpu.memory_space<vmem>>, vector<1x128xf32>,
    return
  }
}

</mosaic_0001>

<bundles_post_ra>
// kernel: tpu_custom_call.1
= control target key start
LH: loop header
LB: loop body
LE: loop exit
PB: predicated region body
PF: predicated region fallthrough
CT: control target
= control target key end

     0   :  { %v329_v1 = vmov 2   ;;  %v330_v2 = vmov 1   ;;  %s413_s0 = inlined_call_operand.vmem [shape: f32[3,128], index: 0, kind: input, shape index: {}]   ;;  %s414_s1 = inlined_call_operand.vmem [shape: f32[32,3], index: 1, kind: input, shape index: {}]   ;;  %s415_s2 = inlined_call_operand.vmem [shape: f32[32,1], index: 2, kind: input, shape index: {}]   ;;  %s416_s3 = inlined_call_operand.vmem [shape: f32[8,32], index: 3, kind: input, shape index: {}]   ;;  %s417_s4 = inlined_call_operand.<no memory space> [shape: f32[1], index: 4, kind: input, shape index: {}]   ;;  %s418_s5 = inlined_call_operand.hbm [shape: f32[1,128], index: 5, kind: output, shape index: {}]  }
   0x1   :  { %v23_v0 = vld [vmem:[%s414_s1] sm:$0xff]  ;;  %298 = vset.pattern.permute.xlu0 %v329_v1  ;;  %297 = vset.pattern.permute.xlu1 %v330_v2  ;;  %v25_v3 = vld [vmem:[%s414_s1 + $0x10] sm:$0xff]  ;;  %v24_v4 = vld [vmem:[%s414_s1 + $0x8] sm:$0xff] }
   0x2   :  { %89 = vperm.xlu0 %298, %v23_v0   ;;  %61 = vperm.xlu1 %297, %v23_v0  }
   0x3   :  { %11 = vsyncpa [#allocation4], 0  ;;  %v331_v5 = vmov 0   ;;  %v26_v6 = vld [vmem:[%s414_s1 + $0x18] sm:$0xff]  ;;  %v28_v7 = vld [vmem:[%s415_s2 + $0x8] sm:$0xff]  ;;  %v332_v11 = vmov 0.0|0.0   ;;  %v52_v18 = vlaneseq }
   0x4   :  { %v27_v8 = vld [vmem:[%s415_s2] sm:$0xff]  ;;  %v29_v9 = vld [vmem:[%s415_s2 + $0x10] sm:$0xff]  ;;  %v30_v10 = vld [vmem:[%s415_s2 + $0x18] sm:$0xff]  ;;  %282 = vmatprep.subr.bf16.mxu0 %v332_v11  ;;  %vm333_vm0 = vmmov 0   ;;  %v334_v12 = vmov 0.0   ;;  %vm144_vm1 = vcmask 261120  }
   0x5   :  { %279 = vmatprep.mubr.msk.f32.mxu0 %vm333_vm0, %v334_v12  ;;  %v53_v20 = vshrl.u32 %v52_v18, 7  ;;  %v22_v25 = vld [vmem:[%s413_s0] sm:$0x7]  ;;  %s335_s10 = smov 2   ;;  %s336_s11 = smov 1  }
   0x6   :  { %97 = vperm.xlu0 %298, %v25_v3   ;;  %65 = vperm.xlu1 %297, %v24_v4  }
   0x7   :  { %v54_v22 = vsub.s32 0, %v53_v20  ;;  %v78_v24 = vsub.s32 1, %v53_v20  ;;  %v106_v27 = vsub.s32 2, %v53_v20 }
   0x9   :  { %v55_v28 = vrot.slane %v22_v25, %v54_v22  ;;  %v79_v29 = vrot.slane %v22_v25, %v78_v24  ;;  %v107_v33 = vrot.slane %v22_v25, %v106_v27 }
   0xa   :  { %302 = vset.pattern.permute.xlu0 %v331_v5  ;;  %299 = vset.pattern.permute.xlu1 %v329_v1 }
   0xb   :  { %34 = vperm.xlu0 %302, %v23_v0   ;;  %93 = vperm.xlu1 %299, %v24_v4  }
   0xf   :  { %39 = vperm.xlu0 %302, %v24_v4   ;;  %300 = vset.pattern.permute.xlu1 %v331_v5  ;;  %v31_v4 = vld [vmem:[%s416_s3] sm:$0xff]  ;;  %s337_s3 = smov [#allocation3]  }
  0x10   :  { %44 = vperm.xlu1 %300, %v25_v3   ;;  %s257_s14 = sshll.u32 %s337_s3, 4  ;;  %s258_s14 = int_to_ptr.vmem [resolvable:$true] %s257_s14 }
  0x11   :  { %s305_s15 = scalar_lea.vmem %s258_s14, 16  ;;  %s309_s16 = scalar_lea.vmem %s258_s14, 32 }
  0x12   :  { %p306_p0 = scmp.ne.s32.totalorder %s258_s14, %s305_s15  ;;  %p310_p1 = scmp.lt.s32.totalorder %s258_s14, %s258_s14 }
  0x13   :  { %49 = vperm.xlu0 %302, %v26_v6   ;;  %p311_p2 = scmp.lt.s32.totalorder %s309_s16, %s305_s15 }
  0x14   :  { %301 = vset.pattern.permute.xlu1 %v330_v2 }
  0x15   :  { %69 = vperm.xlu1 %301, %v25_v3   ;;  %p312_p3 = por %p311_p2, %p310_p1 }
  0x17   :  { %123 = vperm.xlu0 %302, %v28_v7   ;;  %p313_p4 = pnand %p312_p3, %p306_p0 }
  0x19   :  { %73 = vperm.xlu1 %301, %v26_v6  }
  0x1d   :  { %303 = vset.pattern.permute.xlu1 %v329_v1 }
  0x1e   :  { %101 = vperm.xlu1 %303, %v26_v6  }
  0x22   :  { %304 = vset.pattern.permute.xlu1 %v331_v5  ;;  %v219_v5 = vand.u32 127, %v52_v18 }
  0x23   :  { %118 = vperm.xlu1 %304, %v27_v8  }
  0x24   :  { %v224_v6 = vand.u32 15, %v219_v5 }
  0x26   :  { %vm232_vm2 = vcmp.lt.s32.totalorder %v224_v6, 8 }
  0x27   :  { %128 = vperm.xlu1 %304, %v29_v9  }
  0x2b   :  { %133 = vperm.xlu1 %304, %v30_v10  }
  0x81   :  { %v62_v13 = vpop.permute.xlu1 %61  ;;  %v90_v14 = vpop.permute.xlu0 %89 }
  0x82   :  { %v80_v36 = vmul.f32 %v79_v29, %v62_v13  ;;  %v108_v38 = vmul.f32 %v107_v33, %v90_v14 }
  0x85   :  { %v66_v15 = vpop.permute.xlu1 %65  ;;  %v98_v16 = vpop.permute.xlu0 %97 }
  0x86   :  { %v81_v34 = vmul.f32 %v79_v29, %v66_v15  ;;  %v110_v53 = vmul.f32 %v107_v33, %v98_v16 }
  0x8a   :  { %v94_v17 = vpop.permute.xlu1 %93  ;;  %v35_v19 = vpop.permute.xlu0 %34 }
  0x8b   :  { %v56_v35 = vmul.f32 %v55_v28, %v35_v19  ;;  %v109_v40 = vmul.f32 %v107_v33, %v94_v17 }
  0x8d   :  { %v84_v39 = vadd.f32 %v80_v36, %v56_v35 }
  0x8e   :  { %v40_v23 = vpop.permute.xlu0 %39 }
  0x8f   :  { %v45_v21 = vpop.permute.xlu1 %44  ;;  %v57_v30 = vmul.f32 %v55_v28, %v40_v23  ;;  %v112_v47 = vadd.f32 %v108_v38, %v84_v39 }
  0x90   :  { %v58_v45 = vmul.f32 %v55_v28, %v45_v21 }
  0x91   :  { %v85_v37 = vadd.f32 %v81_v34, %v57_v30 }
  0x92   :  { %v50_v31 = vpop.permute.xlu0 %49 }
  0x93   :  { %v113_v44 = vadd.f32 %v109_v40, %v85_v37  ;;  %v59_v49 = vmul.f32 %v55_v28, %v50_v31 }
  0x94   :  { %v70_v26 = vpop.permute.xlu1 %69 }
  0x95   :  { %v82_v43 = vmul.f32 %v79_v29, %v70_v26 }
  0x96   :  { %v124_v42 = vpop.permute.xlu0 %123 }
  0x97   :  { %v137_v46 = vadd.f32 %v124_v42, %v113_v44  ;;  %v86_v50 = vadd.f32 %v82_v43, %v58_v45 }
  0x98   :  { %v74_v32 = vpop.permute.xlu1 %73 }
  0x99   :  { %v83_v51 = vmul.f32 %v79_v29, %v74_v32  ;;  %v141_v54 = vmax.f32 %v137_v46, 0.0  ;;  %v114_v59 = vadd.f32 %v110_v53, %v86_v50 }
  0x9b   :  { %v87_v58 = vadd.f32 %v83_v51, %v59_v49 }
  0x9d   :  { %v102_v41 = vpop.permute.xlu1 %101 }
  0x9e   :  { %v111_v55 = vmul.f32 %v107_v33, %v102_v41 }
  0xa0   :  { %v115_v62 = vadd.f32 %v111_v55, %v87_v58 }
  0xa2   :  { %v119_v48 = vpop.permute.xlu1 %118 }
  0xa3   :  { %v136_v52 = vadd.f32 %v119_v48, %v112_v47 }
  0xa5   :  { %v140_v56 = vmax.f32 %v136_v52, 0.0 }
  0xa6   :  { %v129_v57 = vpop.permute.xlu1 %128 }
  0xa7   :  { %v283_v60 = vpack.c.bf16 %v141_v54, %v140_v56  ;;  %v138_v61 = vadd.f32 %v129_v57, %v114_v59 }
  0xa9   :  { %284 = vmatpush3.bf16.msra.mxu0 %v283_v60  ;;  %v142_v1 = vmax.f32 %v138_v61, 0.0 }
  0xaa   :  { %v134_v63 = vpop.permute.xlu1 %133  ;;  %285 = vmatprep.subr.bf16.mxu0 %v332_v11  ;;  %v237_v11 = vstv %s417_s4 }
  0xab   :  { %v139_v0 = vadd.f32 %v134_v63, %v115_v62 }
  0xad   :  { %v143_v2 = vmax.f32 %v139_v0, 0.0 }
  0xaf   :  { %v286_v3 = vpack.c.bf16 %v143_v2, %v142_v1 }
  0xb1   :  { %287 = vmatpush3.bf16.msra.mxu0 %v286_v3 }
  0xb4   :  { %280 = vmatmul.mubr.msk.f32.vlgmr.msra.gmra.mrb[0].mxu0 %vm144_vm1, %v31_v4 }
 0x187   :  { %v214_v7 = vpop.f32.mrb[0].mxu0 }
 0x188   :  { %v235_v8 = vsel %vm232_vm2, %v214_v7, 0.0  ;;  %v281_v9 = vpop.f32.mrb[1].mxu0 }
 0x189   :  { %v240_v10 = vrot.slane %v235_v8, 1  ;;  %v245_v12 = vrot.slane %v235_v8, 2  ;;  %v238_v13 = vadd.f32 %v237_v11, %v235_v8 }
 0x18b   :  { %247 = vrot.lane.b32.xlu1 %v245_v12, %s335_s10  ;;  %242 = vrot.lane.b32.xlu0 %v240_v10, %s336_s11 }
 0x1fd   :  { %v243_v14 = vpop.permute.xlu0 %242  ;;  %v248_v16 = vpop.permute.xlu1 %247 }
 0x1fe   :  { %v244_v15 = vadd.f32 %v243_v14, %v238_v13 }
 0x200   :  { %v249_v17 = vadd.f32 %v248_v16, %v244_v15 }
 0x202   :  { %250 = vst [vmem:[#allocation3] sm:$0x1] %v249_v17 }
 0x203   :  { %316 = shalt.err (!%p313_p4)
}
 0x204   :  { %s317_s4 = scalar_lea.hbm %s418_s5, 16 }
 0x205   :  { %p318_p5 = scmp.ne.s32.totalorder %s418_s5, %s317_s4  ;;  %p321_p6 = scmp.lt.u32.totalorder %s317_s4, %s418_s5 }
 0x207   :  { %p323_p7 = pnand %p321_p6, %p318_p5 }
 0x209   :  { %326 = shalt.err (!%p323_p7)
}
 0x20a   :  { %260 = dma.vmem_to_hbm [thread:$0]  %s258_s14, 16, %s418_s5, [#allocation4]  }
 0x20b   :  { %327 = dma.done.wait [#allocation4], 16  }
 0x20c   :  { %328 = vsyncadd [#allocation4], 4294967280 }
 0x20d   :  { %264 = vsyncpa [#allocation4], 1 }

</bundles_post_ra>
